<compile_context>
chip_gen: v5e
topology: v5e:2x2
jax: 0.10.0
libtpu: 0.0.40
codegen_flags: <defaults>
</compile_context>

<pallas_src>
import functools

import jax
import jax.numpy as jnp
from jax.experimental import pallas as pl
from jax.experimental.pallas import tpu as pltpu


# ---------------------------------------------------------------------------
# Pallas kernels
# ---------------------------------------------------------------------------
def fused_encoder_kernel(tok_ref, emb_w1_ref, b1_ref, w2_ref, b2_ref,
                         logits_ref, logp_ref):
    """Fused: one-hot embed gather over the folded (embed @ W1) bf16 table
    (length mask folded into the one-hot) -> tanh -> W2 -> logits ->
    log_softmax.  All matmuls feed the MXU with bf16 inputs, f32 accumulation."""
    tm = tok_ref.shape[0]
    vocab = emb_w1_ref.shape[0]

    # Gather-as-matmul: padded rows carry token id -1 -> all-zero one-hot row,
    # which also implements the src_lengths mask.  MXU-friendly while V = 128.
    # TODO(synk): for a real vocab use a scalar-prefetch / DMA row gather.
    tok = tok_ref[...]                                               # [tm, 1] i32
    eq = jax.lax.broadcasted_iota(jnp.int32, (tm, vocab), 1) == tok  # [tm, V]
    onehot = jnp.where(eq, 1.0, 0.0).astype(jnp.bfloat16)

    h = jnp.tanh(
        jnp.dot(onehot, emb_w1_ref[...],                             # bf16 x bf16
                preferred_element_type=jnp.float32) + b1_ref[...])   # [tm, H] f32
    logits = (
        jnp.dot(h.astype(jnp.bfloat16), w2_ref[...],
                preferred_element_type=jnp.float32) + b2_ref[...])   # [tm, V] f32
    logits_ref[...] = logits

    # Numerically stable log_softmax.  probs (when requested) is recovered as
    # exp(logp) downstream, avoiding a third f32 [tm, V] HBM write.
    m = jnp.max(logits, axis=-1, keepdims=True)
    shifted = logits - m
    s = jnp.sum(jnp.exp(shifted), axis=-1, keepdims=True)
    logp_ref[...] = shifted - jnp.log(s)


def normalize_kernel(logits_ref, out_ref, *, log_probs):
    """Fallback get_normalized_probs for logits not produced by forward().
    Writes ONLY the requested tensor (static flag) -> half the HBM writeback."""
    x = logits_ref[...].astype(jnp.float32)
    m = jnp.max(x, axis=-1, keepdims=True)
    shifted = x - m
    ex = jnp.exp(shifted)
    s = jnp.sum(ex, axis=-1, keepdims=True)
    if log_probs:
        out_ref[...] = shifted - jnp.log(s)
    else:
        out_ref[...] = ex / s   # exact: rows sum to 1 within f32 rounding


# ---------------------------------------------------------------------------
# Wrappers
# ---------------------------------------------------------------------------
def _row_block(m, cap=256):
    """Row tile: multiple of 8 when possible, <= cap (v5e spill headroom),
    dividing m, and leaving >= 2 grid steps when possible so v7x's two
    TensorCores both get work under dimension_semantics=('parallel',)."""
    fallback = m
    for tm in (256, 128, 64, 32, 16, 8):
        if tm <= cap and m % tm == 0:
            if 2 * tm <= m:
                return tm               # largest tile that still leaves 2 steps
            fallback = min(fallback, tm)
    return fallback


def _pinned(shape, single_buffer):
    """Full-array block whose block index never changes across the row grid.
    With single_buffer=True, skip the default double buffer (halves weight
    VMEM; constant-index blocks need no pipelining)."""
    index_map = lambda *_: (0,) * len(shape)
    if single_buffer:
        return pl.BlockSpec(shape, index_map, pipeline_mode=pl.Buffered(1))
    return pl.BlockSpec(shape, index_map)


def run_fused_encoder(tok_col, emb_w1, b1, w2, b2):
    """tok_col: [M, 1] int32 with padded positions set to -1; emb_w1/w2 bf16;
    b1/b2 f32.  Returns (logits, log_probs), both f32 [M, V]."""
    m = tok_col.shape[0]
    hdim = emb_w1.shape[1]
    v = w2.shape[1]
    tm = _row_block(m)
    row_spec = pl.BlockSpec((tm, v), lambda i: (i, 0))
    out_sds = jax.ShapeDtypeStruct((m, v), jnp.float32)

    # Explicit scoped-VMEM budget: single-buffered weights + double-buffered
    # per-step blocks + intermediate headroom, clamped to safe bounds.
    weight_bytes = sum(int(a.size) * a.dtype.itemsize for a in (emb_w1, b1, w2, b2))
    step_bytes = (tm * 4                 # token-id block (i32)
                  + 2 * tm * v * 4       # logits + logp output blocks (f32)
                  + tm * v * 2           # one-hot intermediate (bf16)
                  + 2 * tm * hdim * 4)   # hidden intermediates (f32)
    vmem_limit = int(min(max(weight_bytes + 4 * step_bytes, 16 << 20), 48 << 20))

    def call(single_buffer):
        grid_spec = pltpu.PrefetchScalarGridSpec(
            num_scalar_prefetch=0,
            grid=(m // tm,),
            in_specs=[
                pl.BlockSpec((tm, 1), lambda i: (i, 0)),   # masked token ids
                _pinned(emb_w1.shape, single_buffer),
                _pinned(b1.shape, single_buffer),
                _pinned(w2.shape, single_buffer),
                _pinned(b2.shape, single_buffer),
            ],
            out_specs=(row_spec, row_spec),
        )
        return pl.pallas_call(
            fused_encoder_kernel,
            out_shape=(out_sds, out_sds),
            grid_spec=grid_spec,
            compiler_params=pltpu.CompilerParams(
                dimension_semantics=("parallel",),
                vmem_limit_bytes=vmem_limit),
        )(tok_col, emb_w1, b1, w2, b2)

    try:
        return call(single_buffer=True)
    except Exception:
        # pl.Buffered(1) not supported by this jax version: fall back to the
        # default double-buffered pinned weights (correctness unaffected).
        return call(single_buffer=False)


def run_normalize(logits_flat, log_probs):
    m, v = logits_flat.shape
    tm = _row_block(m)
    row_spec = pl.BlockSpec((tm, v), lambda i: (i, 0))
    vmem_limit = int(min(max(4 * (2 * tm * v * 4), 16 << 20), 48 << 20))
    return pl.pallas_call(
        functools.partial(normalize_kernel, log_probs=log_probs),
        out_shape=jax.ShapeDtypeStruct((m, v), jnp.float32),
        grid_spec=pltpu.PrefetchScalarGridSpec(
            num_scalar_prefetch=0,
            grid=(m // tm,),
            in_specs=[pl.BlockSpec((tm, v), lambda i: (i, 0))],
            out_specs=row_spec,
        ),
        compiler_params=pltpu.CompilerParams(
            dimension_semantics=("parallel",),
            vmem_limit_bytes=vmem_limit),
    )(logits_flat)


class FairseqEncoderModelPallas:
    """JAX/Pallas analogue of fairseq FairseqEncoderModel(BaseFairseqModel)."""

    def __init__(self, embed_tokens, w1, b1, w2, b2):
        # Fold embed @ W1 once (exact: no nonlinearity between them) and cast
        # all MXU operands to bf16 once, instead of per grid step in-kernel.
        self.emb_w1 = jnp.dot(embed_tokens, w1,
                              preferred_element_type=jnp.float32).astype(jnp.bfloat16)
        self.b1 = b1.astype(jnp.float32)              # [1, H]
        self.w2 = w2.astype(jnp.bfloat16)             # [H, V]
        self.b2 = b2.astype(jnp.float32)              # [1, V]
        self._cache = None                            # (net_output, log_probs)

    def forward(self, src_tokens, src_lengths, **kwargs):
        # NOTE: the stub returns None; the real FairseqEncoderModel returns
        # self.encoder(src_tokens, src_lengths).  Synthetic encoder here.
        B, T = src_tokens.shape
        valid = jnp.arange(T, dtype=jnp.int32)[None, :] < src_lengths[:, None]
        tok = jnp.where(valid, src_tokens, -1).astype(jnp.int32).reshape(B * T, 1)
        logits, logp = run_fused_encoder(tok, self.emb_w1, self.b1, self.w2, self.b2)
        V = logits.shape[-1]
        net_output = logits.reshape(B, T, V)
        # Padded positions still produce a valid softmax over the bias row;
        # consumers must apply the length mask themselves (fairseq semantics).
        self._cache = (net_output, logp.reshape(B, T, V))
        return net_output

    def get_normalized_probs(self, net_output, log_probs, sample=None):
        if self._cache is not None and net_output is self._cache[0]:
            lp = self._cache[1]
            return lp if log_probs else jnp.exp(lp)   # probs consistent with logp
        # Logits from elsewhere: single kernel pass writing only the requested tensor.
        B, T, V = net_output.shape
        out = run_normalize(net_output.reshape(B * T, V).astype(jnp.float32), log_probs)
        return out.reshape(B, T, V)

    def get_targets(self, sample, net_output):
        return sample["target"]

    def max_positions(self):
        return None

    # TODO(synk): make_generation_fast_ / load_state_dict / upgrade_state_dict /
    # prepare_for_onnx_export_ are torch-module bookkeeping with no Pallas
    # equivalent.


# ---------------------------------------------------------------------------
# Main
# ---------------------------------------------------------------------------
if __name__ == "__main__":
    B, T, E, H, V = 2, 8, 32, 128, 128   # H lane-aligned (128) per v6e feedback

    key = jax.random.PRNGKey(0)
    k_emb, k_w1, k_w2, k_tok = jax.random.split(key, 4)

    embed_tokens = jax.random.normal(k_emb, (V, E), jnp.float32) * 0.1
    w1 = jax.random.normal(k_w1, (E, H), jnp.float32) * 0.1
    b1 = jnp.zeros((1, H), jnp.float32)
    w2 = jax.random.normal(k_w2, (H, V), jnp.float32) * 0.1
    b2 = jnp.zeros((1, V), jnp.float32)

    src_tokens = jax.random.randint(k_tok, (B, T), 0, V, jnp.int32)
    src_lengths = jnp.array([T, T - 3], jnp.int32)

    model = FairseqEncoderModelPallas(embed_tokens, w1, b1, w2, b2)

    net_output = model.forward(src_tokens, src_lengths)
    log_probs = model.get_normalized_probs(net_output, log_probs=True)
    probs = model.get_normalized_probs(net_output, log_probs=False)
    jax.block_until_ready((net_output, log_probs, probs))

    # --- Plain-JAX references (mirroring the kernel's bf16 MXU inputs) -------
    valid = jnp.arange(T)[None, :] < src_lengths[:, None]
    emb_w1_q = model.emb_w1.astype(jnp.float32)           # folded, bf16-quantized
    x_ref = emb_w1_q[src_tokens] * valid[..., None].astype(jnp.float32)   # [B,T,H]
    h_ref = jnp.tanh(x_ref + b1)                                           # [B,T,H]
    logits_ref = (
        jnp.dot(h_ref.reshape(B * T, H).astype(jnp.bfloat16), model.w2,
                preferred_element_type=jnp.float32) + b2).reshape(B, T, V)
    assert jnp.allclose(net_output, logits_ref, atol=2e-3), "encoder mismatch"

    ref_lp = jax.nn.log_softmax(net_output.astype(jnp.float32), axis=-1)
    ref_p = jax.nn.softmax(net_output.astype(jnp.float32), axis=-1)
    assert jnp.allclose(log_probs, ref_lp, atol=1e-5), "log_softmax mismatch"
    assert jnp.allclose(probs, ref_p, atol=1e-5), "softmax mismatch"
    assert jnp.allclose(jnp.sum(probs, axis=-1), 1.0, atol=1e-4)

    # Exercise the standalone (non-cached) normalization kernels too.
    detached = net_output + 0.0
    lp2 = model.get_normalized_probs(detached, log_probs=True)
    p2 = model.get_normalized_probs(detached, log_probs=False)
    jax.block_until_ready((lp2, p2))
    assert jnp.allclose(lp2, ref_lp, atol=1e-5), "fallback log_softmax mismatch"
    assert jnp.allclose(p2, ref_p, atol=1e-5), "fallback softmax mismatch"

    print("KERNEL_OK")
</pallas_src>

<mosaic_0001>
module attributes {stable_mosaic.version = 11 : i64} {
  func.func @fused_encoder_kernel(%arg0: i32, %arg1: memref<8x1xi32, #tpu.memory_space<vmem>>, %arg2: memref<128x128xbf16, #tpu.memory_space<vmem>>, %arg3: memref<1x128xf32, #tpu.memory_space<vmem>>, %arg4: memref<128x128xbf16, #tpu.memory_space<vmem>>, %arg5: memref<1x128xf32, #tpu.memory_space<vmem>>, %arg6: memref<8x128xf32, #tpu.memory_space<vmem>>, %arg7: memref<8x128xf32, #tpu.memory_space<vmem>>) attributes {dimension_semantics = [#tpu.dimension_semantics<parallel>], iteration_bounds = array<i64: 2>, scalar_prefetch = 0 : i64, scratch_operands = 0 : i64, tpu.core_type = #tpu.core_type<tc>, window_params = [{transform_indices = @transform_0, window_bounds = array<i64: 8, 1>}, {pipeline_mode = #tpu.pipeline_mode<synchronous>, transform_indices = @transform_1, window_bounds = array<i64: 128, 128>}, {pipeline_mode = #tpu.pipeline_mode<synchronous>, transform_indices = @transform_2, window_bounds = array<i64: 1, 128>}, {pipeline_mode = #tpu.pipeline_mode<synchronous>, transform_indices = @transform_3, window_bounds = array<i64: 128, 128>}, {pipeline_mode = #tpu.pipeline_mode<synchronous>, transform_indices = @transform_4, window_bounds = array<i64: 1, 128>}, {transform_indices = @transform_5, window_bounds = array<i64: 8, 128>}, {transform_indices = @transform_6, window_bounds = array<i64: 8, 128>}]} {
    %c0 = arith.constant 0 : index
    %c0_0 = arith.constant 0 : index
    %0 = vector.load %arg1[%c0, %c0_0] : memref<8x1xi32, #tpu.memory_space<vmem>>, vector<8x1xi32>
    %1 = tpu.iota {dimensions = array<i32: 1>} : vector<8x128xi32>
    %2 = vector.broadcast %0 : vector<8x1xi32> to vector<8x128xi32>
    %3 = arith.cmpi eq, %1, %2 : vector<8x128xi32>
    %cst = arith.constant 1.000000e+00 : f32
    %cst_1 = arith.constant 0.000000e+00 : f32
    %4 = vector.broadcast %cst : f32 to vector<8x128xf32>
    %5 = vector.broadcast %cst_1 : f32 to vector<8x128xf32>
    %6 = arith.select %3, %4, %5 : vector<8x128xi1>, vector<8x128xf32>
    %7 = arith.truncf %6 : vector<8x128xf32> to vector<8x128xbf16>
    %c0_2 = arith.constant 0 : index
    %c0_3 = arith.constant 0 : index
    %8 = vector.load %arg2[%c0_2, %c0_3] : memref<128x128xbf16, #tpu.memory_space<vmem>>, vector<128x128xbf16>
    %cst_4 = arith.constant dense<0.000000e+00> : vector<8x128xf32>
    %9 = tpu.matmul %7, %8, %cst_4 {dimension_numbers = #tpu.dot_dimension_numbers<[1], [0], [0], [1], [0, 0, 1, 1], [], []>} : vector<8x128xbf16>, vector<128x128xbf16>, vector<8x128xf32> -> vector<8x128xf32>
    %c0_5 = arith.constant 0 : index
    %c0_6 = arith.constant 0 : index
    %10 = vector.load %arg3[%c0_5, %c0_6] : memref<1x128xf32, #tpu.memory_space<vmem>>, vector<1x128xf32>
    %11 = vector.broadcast %10 : vector<1x128xf32> to vector<8x128xf32>
    %12 = arith.addf %9, %11 : vector<8x128xf32>
    %13 = math.tanh %12 : vector<8x128xf32>
    %14 = arith.truncf %13 : vector<8x128xf32> to vector<8x128xbf16>
    %c0_7 = arith.constant 0 : index
    %c0_8 = arith.constant 0 : index
    %15 = vector.load %arg4[%c0_7, %c0_8] : memref<128x128xbf16, #tpu.memory_space<vmem>>, vector<128x128xbf16>
    %cst_9 = arith.constant dense<0.000000e+00> : vector<8x128xf32>
    %16 = tpu.matmul %14, %15, %cst_9 {dimension_numbers = #tpu.dot_dimension_numbers<[1], [0], [0], [1], [0, 0, 1, 1], [], []>} : vector<8x128xbf16>, vector<128x128xbf16>, vector<8x128xf32> -> vector<8x128xf32>
    %c0_10 = arith.constant 0 : index
    %c0_11 = arith.constant 0 : index
    %17 = vector.load %arg5[%c0_10, %c0_11] : memref<1x128xf32, #tpu.memory_space<vmem>>, vector<1x128xf32>
    %18 = vector.broadcast %17 : vector<1x128xf32> to vector<8x128xf32>
    %19 = arith.addf %16, %18 : vector<8x128xf32>
    %c0_12 = arith.constant 0 : index
    %c0_13 = arith.constant 0 : index
    %20 = vector.load %arg6[%c0_12, %c0_13] : memref<8x128xf32, #tpu.memory_space<vmem>>, vector<8x128xf32>
    tpu.vector_store %arg6[%c0_12, %c0_13], %19 {strides = array<i32>} : memref<8x128xf32, #tpu.memory_space<vmem>>, vector<8x128xf32>,
    %cst_14 = arith.constant dense<0xFF800000> : vector<8xf32>
    %21 = vector.multi_reduction <maximumf>, %19, %cst_14 [1] : vector<8x128xf32> to vector<8xf32>
    %22 = vector.shape_cast %21 : vector<8xf32> to vector<8x1xf32>
    %23 = vector.broadcast %22 : vector<8x1xf32> to vector<8x128xf32>
    %24 = arith.subf %19, %23 : vector<8x128xf32>
    %25 = math.exp %24 : vector<8x128xf32>
    %cst_15 = arith.constant dense<0.000000e+00> : vector<8xf32>
    %26 = vector.multi_reduction <add>, %25, %cst_15 [1] : vector<8x128xf32> to vector<8xf32>
    %27 = vector.shape_cast %26 : vector<8xf32> to vector<8x1xf32>
    %28 = math.log %27 : vector<8x1xf32>
    %29 = vector.broadcast %28 : vector<8x1xf32> to vector<8x128xf32>
    %30 = arith.subf %24, %29 : vector<8x128xf32>
    %c0_16 = arith.constant 0 : index
    %c0_17 = arith.constant 0 : index
    %31 = vector.load %arg7[%c0_16, %c0_17] : memref<8x128xf32, #tpu.memory_space<vmem>>, vector<8x128xf32>
    tpu.vector_store %arg7[%c0_16, %c0_17], %30 {strides = array<i32>} : memref<8x128xf32, #tpu.memory_space<vmem>>, vector<8x128xf32>,
    return
  }
  func.func @transform_0(%arg0: i32) -> (i32, i32) {
    %c0_i32 = arith.constant 0 : i32
    %c0_i32_0 = arith.constant 0 : i32
    return %arg0, %c0_i32 : i32, i32
  }
  func.func @transform_1(%arg0: i32) -> (i32, i32) {
    %c0_i32 = arith.constant 0 : i32
    %c0_i32_0 = arith.constant 0 : i32
    %c0_i32_1 = arith.constant 0 : i32
    return %c0_i32, %c0_i32_0 : i32, i32
  }
  func.func @transform_2(%arg0: i32) -> (i32, i32) {
    %c0_i32 = arith.constant 0 : i32
    %c0_i32_0 = arith.constant 0 : i32
    %c0_i32_1 = arith.constant 0 : i32
    return %c0_i32, %c0_i32_0 : i32, i32
  }
  func.func @transform_3(%arg0: i32) -> (i32, i32) {
    %c0_i32 = arith.constant 0 : i32
    %c0_i32_0 = arith.constant 0 : i32
    %c0_i32_1 = arith.constant 0 : i32
    return %c0_i32, %c0_i32_0 : i32, i32
  }
  func.func @transform_4(%arg0: i32) -> (i32, i32) {
    %c0_i32 = arith.constant 0 : i32
    %c0_i32_0 = arith.constant 0 : i32
    %c0_i32_1 = arith.constant 0 : i32
    return %c0_i32, %c0_i32_0 : i32, i32
  }
  func.func @transform_5(%arg0: i32) -> (i32, i32) {
    %c0_i32 = arith.constant 0 : i32
    %c0_i32_0 = arith.constant 0 : i32
    return %arg0, %c0_i32 : i32, i32
  }
  func.func @transform_6(%arg0: i32) -> (i32, i32) {
    %c0_i32 = arith.constant 0 : i32
    %c0_i32_0 = arith.constant 0 : i32
    return %arg0, %c0_i32 : i32, i32
  }
}

module attributes {stable_mosaic.version = 11 : i64} {
  func.func @fused_encoder_kernel(%arg0: i32, %arg1: memref<8x1xi32, #tpu.memory_space<vmem>>, %arg2: memref<128x128xbf16, #tpu.memory_space<vmem>>, %arg3: memref<1x128xf32, #tpu.memory_space<vmem>>, %arg4: memref<128x128xbf16, #tpu.memory_space<vmem>>, %arg5: memref<1x128xf32, #tpu.memory_space<vmem>>, %arg6: memref<8x128xf32, #tpu.memory_space<vmem>>, %arg7: memref<8x128xf32, #tpu.memory_space<vmem>>) attributes {dimension_semantics = [#tpu.dimension_semantics<parallel>], iteration_bounds = array<i64: 2>, scalar_prefetch = 0 : i64, scratch_operands = 0 : i64, tpu.core_type = #tpu.core_type<tc>, window_params = [{transform_indices = @transform_0, window_bounds = array<i64: 8, 1>}, {pipeline_mode = #tpu.pipeline_mode<synchronous>, transform_indices = @transform_1, window_bounds = array<i64: 128, 128>}, {pipeline_mode = #tpu.pipeline_mode<synchronous>, transform_indices = @transform_2, window_bounds = array<i64: 1, 128>}, {pipeline_mode = #tpu.pipeline_mode<synchronous>, transform_indices = @transform_3, window_bounds = array<i64: 128, 128>}, {pipeline_mode = #tpu.pipeline_mode<synchronous>, transform_indices = @transform_4, window_bounds = array<i64: 1, 128>}, {transform_indices = @transform_5, window_bounds = array<i64: 8, 128>}, {transform_indices = @transform_6, window_bounds = array<i64: 8, 128>}]} {
    %c0 = arith.constant 0 : index
    %c0_0 = arith.constant 0 : index
    %0 = vector.load %arg1[%c0, %c0_0] : memref<8x1xi32, #tpu.memory_space<vmem>>, vector<8x1xi32>
    %1 = tpu.iota {dimensions = array<i32: 1>} : vector<8x128xi32>
    %2 = vector.broadcast %0 : vector<8x1xi32> to vector<8x128xi32>
    %3 = arith.cmpi eq, %1, %2 : vector<8x128xi32>
    %cst = arith.constant 1.000000e+00 : f32
    %cst_1 = arith.constant 0.000000e+00 : f32
    %4 = vector.broadcast %cst : f32 to vector<8x128xf32>
    %5 = vector.broadcast %cst_1 : f32 to vector<8x128xf32>
    %6 = arith.select %3, %4, %5 : vector<8x128xi1>, vector<8x128xf32>
    %7 = arith.truncf %6 : vector<8x128xf32> to vector<8x128xbf16>
    %c0_2 = arith.constant 0 : index
    %c0_3 = arith.constant 0 : index
    %8 = vector.load %arg2[%c0_2, %c0_3] : memref<128x128xbf16, #tpu.memory_space<vmem>>, vector<128x128xbf16>
    %cst_4 = arith.constant dense<0.000000e+00> : vector<8x128xf32>
    %9 = tpu.matmul %7, %8, %cst_4 {dimension_numbers = #tpu.dot_dimension_numbers<[1], [0], [0], [1], [0, 0, 1, 1], [], []>} : vector<8x128xbf16>, vector<128x128xbf16>, vector<8x128xf32> -> vector<8x128xf32>
    %c0_5 = arith.constant 0 : index
    %c0_6 = arith.constant 0 : index
    %10 = vector.load %arg3[%c0_5, %c0_6] : memref<1x128xf32, #tpu.memory_space<vmem>>, vector<1x128xf32>
    %11 = vector.broadcast %10 : vector<1x128xf32> to vector<8x128xf32>
    %12 = arith.addf %9, %11 : vector<8x128xf32>
    %13 = math.tanh %12 : vector<8x128xf32>
    %14 = arith.truncf %13 : vector<8x128xf32> to vector<8x128xbf16>
    %c0_7 = arith.constant 0 : index
    %c0_8 = arith.constant 0 : index
    %15 = vector.load %arg4[%c0_7, %c0_8] : memref<128x128xbf16, #tpu.memory_space<vmem>>, vector<128x128xbf16>
    %cst_9 = arith.constant dense<0.000000e+00> : vector<8x128xf32>
    %16 = tpu.matmul %14, %15, %cst_9 {dimension_numbers = #tpu.dot_dimension_numbers<[1], [0], [0], [1], [0, 0, 1, 1], [], []>} : vector<8x128xbf16>, vector<128x128xbf16>, vector<8x128xf32> -> vector<8x128xf32>
    %c0_10 = arith.constant 0 : index
    %c0_11 = arith.constant 0 : index
    %17 = vector.load %arg5[%c0_10, %c0_11] : memref<1x128xf32, #tpu.memory_space<vmem>>, vector<1x128xf32>
    %18 = vector.broadcast %17 : vector<1x128xf32> to vector<8x128xf32>
    %19 = arith.addf %16, %18 : vector<8x128xf32>
    %c0_12 = arith.constant 0 : index
    %c0_13 = arith.constant 0 : index
    %20 = vector.load %arg6[%c0_12, %c0_13] : memref<8x128xf32, #tpu.memory_space<vmem>>, vector<8x128xf32>
    tpu.vector_store %arg6[%c0_12, %c0_13], %19 {strides = array<i32>} : memref<8x128xf32, #tpu.memory_space<vmem>>, vector<8x128xf32>,
    %cst_14 = arith.constant dense<0xFF800000> : vector<8xf32>
    %21 = vector.multi_reduction <maximumf>, %19, %cst_14 [1] : vector<8x128xf32> to vector<8xf32>
    %22 = vector.shape_cast %21 : vector<8xf32> to vector<8x1xf32>
    %23 = vector.broadcast %22 : vector<8x1xf32> to vector<8x128xf32>
    %24 = arith.subf %19, %23 : vector<8x128xf32>
    %25 = math.exp %24 : vector<8x128xf32>
    %cst_15 = arith.constant dense<0.000000e+00> : vector<8xf32>
    %26 = vector.multi_reduction <add>, %25, %cst_15 [1] : vector<8x128xf32> to vector<8xf32>
    %27 = vector.shape_cast %26 : vector<8xf32> to vector<8x1xf32>
    %28 = math.log %27 : vector<8x1xf32>
    %29 = vector.broadcast %28 : vector<8x1xf32> to vector<8x128xf32>
    %30 = arith.subf %24, %29 : vector<8x128xf32>
    %c0_16 = arith.constant 0 : index
    %c0_17 = arith.constant 0 : index
    %31 = vector.load %arg7[%c0_16, %c0_17] : memref<8x128xf32, #tpu.memory_space<vmem>>, vector<8x128xf32>
    tpu.vector_store %arg7[%c0_16, %c0_17], %30 {strides = array<i32>} : memref<8x128xf32, #tpu.memory_space<vmem>>, vector<8x128xf32>,
    return
  }
  func.func @transform_0(%arg0: i32) -> (i32, i32) {
    %c0_i32 = arith.constant 0 : i32
    %c0_i32_0 = arith.constant 0 : i32
    return %arg0, %c0_i32 : i32, i32
  }
  func.func @transform_1(%arg0: i32) -> (i32, i32) {
    %c0_i32 = arith.constant 0 : i32
    %c0_i32_0 = arith.constant 0 : i32
    %c0_i32_1 = arith.constant 0 : i32
    return %c0_i32, %c0_i32_0 : i32, i32
  }
  func.func @transform_2(%arg0: i32) -> (i32, i32) {
    %c0_i32 = arith.constant 0 : i32
    %c0_i32_0 = arith.constant 0 : i32
    %c0_i32_1 = arith.constant 0 : i32
    return %c0_i32, %c0_i32_0 : i32, i32
  }
  func.func @transform_3(%arg0: i32) -> (i32, i32) {
    %c0_i32 = arith.constant 0 : i32
    %c0_i32_0 = arith.constant 0 : i32
    %c0_i32_1 = arith.constant 0 : i32
    return %c0_i32, %c0_i32_0 : i32, i32
  }
  func.func @transform_4(%arg0: i32) -> (i32, i32) {
    %c0_i32 = arith.constant 0 : i32
    %c0_i32_0 = arith.constant 0 : i32
    %c0_i32_1 = arith.constant 0 : i32
    return %c0_i32, %c0_i32_0 : i32, i32
  }
  func.func @transform_5(%arg0: i32) -> (i32, i32) {
    %c0_i32 = arith.constant 0 : i32
    %c0_i32_0 = arith.constant 0 : i32
    return %arg0, %c0_i32 : i32, i32
  }
  func.func @transform_6(%arg0: i32) -> (i32, i32) {
    %c0_i32 = arith.constant 0 : i32
    %c0_i32_0 = arith.constant 0 : i32
    return %arg0, %c0_i32 : i32, i32
  }
}

</mosaic_0001>

<bundles_post_ra>
// kernel: tpu_custom_call.1
= control target key start
LH: loop header
LB: loop body
LE: loop exit
PB: predicated region body
PF: predicated region fallthrough
CT: control target
= control target key end

     0   :  { %12 = vsyncpa [#allocation3], 0  ;;  %s1146_s0 = inlined_call_operand.vmem [shape: s32[16,1], index: 0, kind: input, shape index: {}]   ;;  %s1147_s1 = inlined_call_operand.hbm [shape: bf16[128,128], index: 1, kind: input, shape index: {}]   ;;  %s1148_s2 = inlined_call_operand.vmem [shape: f32[1,128], index: 2, kind: input, shape index: {}]   ;;  %s1149_s3 = inlined_call_operand.hbm [shape: bf16[128,128], index: 3, kind: input, shape index: {}]   ;;  %s1150_s4 = inlined_call_operand.vmem [shape: f32[1,128], index: 4, kind: input, shape index: {}]   ;;  %s1151_s5 = inlined_call_operand.hbm [shape: f32[16,128], index: 5, kind: output, shape index: {0}]   ;;  %s1152_s6 = inlined_call_operand.hbm [shape: f32[16,128], index: 6, kind: output, shape index: {1}]  }
   0x1   :  { %13 = vsyncpa [#allocation6], 0 }
   0x2   :  { %14 = vsyncpa [#allocation4], 0 }
   0x3   :  { %16 = vsyncpa [#allocation4 + $0x1], 0 }
   0x4   :  { %17 = vsyncpa [#allocation9], 0 }
   0x5   :  { %19 = vsyncpa [#allocation9 + $0x1], 0  ;;  %s1008_s21 = smov 0   ;;  %s1010_s22 = smov 0  }
   0x6   :  { %s1012_s23 = smov 0   ;;  %s1014_s24 = smov 0  }
   0x7 LB: > { %s1029_s25 = sadd.s32 4294967295, %s965_s24   ;;  %s626_s26 = sadd.s32 4294967294, %s965_s24   ;;  %s965_s24 = sphi %s1014_s24, %s1159_s24   ;;  %s961_s23 = sphi %s1012_s23, %s1158_s23   ;;  %s957_s22 = sphi %s1010_s22, %s1157_s22   ;;  %s953_s21 = sphi %s1008_s21, %s1156_s21  }
   0x8   : > { %s1033_s27 = sadd.s32 1, %s965_s24   ;;  %s142_s28 = sadd.s32 1, %s961_s23 }
   0x9   : > { %s139_s29 = ssub.s32 %s965_s24, %s1033_s27  ;;  %p152_p0 = scmp.ne.s32.totalorder %s961_s23, %s957_s22 }
   0xa   : > { %p140_p1 = scmp.eq.s32.totalorder %s139_s29, 0  ;;  %p153_p2 = scmp.eq.s32.totalorder %s1029_s25, 1 }
   0xb   : > { %p158_p3 = scmp.ne.s32.totalorder %s957_s22, %s953_s21  ;;  %p159_p4 = scmp.eq.s32.totalorder %s626_s26, 1 }
   0xc   : > { %s1044_s30 = scalar_select %p140_p1, %s961_s23, %s142_s28  }
   0xd   : > { %p1046_p5 = por %p153_p2, %p152_p0  ;;  %p1050_p6 = por %p159_p4, %p158_p3 }
   0xe   : > { %p627_p7 = scmp.ge.s32.totalorder %s965_s24, 1  ;;  %p192_p8 = scmp.lt.s32.totalorder %s965_s24, 3 }
   0xf   : > { %p751_p9 = scmp.eq.s32.totalorder %s1029_s25, 0  ;;  %s203_s12 = sshll.u32 %s1147_s1, 4  ;;  %s204_s12 = int_to_ptr.hbm [resolvable:$true] %s203_s12 }
  0x10   : > { %p1057_p10 = pnand %p627_p7, %p192_p8  ;;  %s967_s13 = smov [#allocation2]  }
  0x11   : > { %s205_s14 = sshll.u32 %s967_s13, 4  ;;  %s220_s17 = sshll.u32 %s1149_s3, 4  ;;  %s206_s14 = int_to_ptr.vmem [resolvable:$true] %s205_s14  ;;  %s221_s17 = int_to_ptr.hbm [resolvable:$true] %s220_s17 }
  0x12   : > { %p737_p11 = pneg %p1057_p10  ;;  %s968_s18 = smov 64  }
  0x13   : > { %s969_s19 = smov 4   ;;  %s970_s20 = smov [#allocation5]  }
  0x14   : > { %p738_p12 = pnand %p751_p9, %p737_p11  ;;  %s222_s26 = sshll.u32 %s970_s20, 4  ;;  %s223_s26 = int_to_ptr.vmem [resolvable:$true] %s222_s26 }
  0x15   : > { %248 = sbr.rel (%p1057_p10) target bundleno = 675 (0x2a3), region = 40 }
  0x16   : > { %740 = dma.hbm_to_vmem [thread:$0]  (!%p738_p12), %s204_s12, 1024, %s206_s14, [#allocation3], %s968_s18, %s968_s18, %s969_s19  }
  0x17   : > { %743 = dma.hbm_to_vmem [thread:$0]  (!%p738_p12), %s221_s17, 1024, %s223_s26, [#allocation6], %s968_s18, %s968_s18, %s969_s19  }
  0x1a   : > { %936 = dma.done.wait (%p751_p9), [#allocation3], 1024  }
  0x1b   : > { %938 = vsyncadd (%p751_p9), [#allocation3], 4294966272 }
  0x1c   : > { %940 = dma.done.wait (%p751_p9), [#allocation6], 1024  }
  0x1d   : > { %942 = vsyncadd (%p751_p9), [#allocation6], 4294966272  ;;  %p288_p13 = scmp.lt.s32.totalorder %s1029_s25, 1  ;;  %v971_v0 = vmov 0   ;;  %v716_v2 = vld [vmem:[#allocation2 + $0x38] sm:$0xff]  ;;  %v715_v3 = vld [vmem:[#allocation2 + $0x30] sm:$0xff]  ;;  %v293_v15 = vlaneseq }
  0x1e   : > { %794 = vset.pattern.permute.xlu0 %v971_v0  ;;  %369 = vmatpush.bf16.msra.mxu0 %v716_v2  ;;  %v714_v4 = vld [vmem:[#allocation2 + $0x28] sm:$0xff]  ;;  %v713_v5 = vld [vmem:[#allocation2 + $0x20] sm:$0xff]  ;;  %v712_v6 = vld [vmem:[#allocation2 + $0x18] sm:$0xff]  ;;  %v972_v18 = vmov 1.0|1.0   ;;  %s1090_s14 = sand.u32 1, %s957_s22  }
  0x1f   : > { %s289_s28 = scalar_select %p288_p13, %s1029_s25, 1  ;;  %v711_v7 = vld [vmem:[#allocation2 + $0x10] sm:$0xff]  ;;  %v710_v8 = vld [vmem:[#allocation2 + $0x8] sm:$0xff]  ;;  %v709_v9 = vld [vmem:[#allocation2] sm:$0xff]  ;;  %v294_v16 = vand.u32 127, %v293_v15 }
  0x20   : > { %v724_v10 = vld [vmem:[#allocation5 + $0x38] sm:$0xff]  ;;  %v723_v11 = vld [vmem:[#allocation5 + $0x30] sm:$0xff]  ;;  %v722_v12 = vld [vmem:[#allocation5 + $0x28] sm:$0xff]  ;;  %s634_s15 = sshll.u32 %s1090_s14, 3  ;;  %s705_s19 = sshll.u32 %s1029_s25, 3 }
  0x21   : > { %s636_s29 = sshll.u32 %s289_s28, 3  ;;  %452 = vmatpush.bf16.msra.mxu1 %v724_v10  ;;  %v721_v13 = vld [vmem:[#allocation5 + $0x20] sm:$0xff]  ;;  %v720_v14 = vld [vmem:[#allocation5 + $0x18] sm:$0xff]  ;;  %v719_v19 = vld [vmem:[#allocation5 + $0x10] sm:$0xff]  ;;  %s280_s18 = scalar_lea.vmem [#allocation7], %s634_s15 }
  0x22   : > { %s291_s11 = scalar_lea.vmem %s1146_s0, %s636_s29  ;;  %370 = vmatpush.bf16.msra.mxu0 %v715_v3  ;;  %v718_v20 = vld [vmem:[#allocation5 + $0x8] sm:$0xff]  ;;  %v717_v21 = vld [vmem:[#allocation5] sm:$0xff]  ;;  %s493_s28 = scalar_lea.hbm %s1151_s5, %s705_s19 }
  0x23   : > { %v292_v1 = vld [vmem:[%s291_s11] sm:$0xff]  ;;  %s495_s29 = sshll.u32 %s280_s18, 4  ;;  %s497_s9 = sshll.u32 %s493_s28, 4  ;;  %s496_s29 = int_to_ptr.vmem [resolvable:$true] %s495_s29  ;;  %s498_s9 = int_to_ptr.hbm [resolvable:$true] %s497_s9 }
  0x24   : > { %296 = vperm.xlu0 %794, %v292_v1   ;;  %v795_v22 = vld [vmem:[%s1148_s2] ss:$0 sm:$0xff]  ;;  %s478_s10 = scalar_lea.sflag [#allocation4], %s1090_s14  ;;  %s877_s11 = sshra.s32 %s498_s9, 4  ;;  %s878_s11 = int_to_ptr.hbm [resolvable:$true] %s877_s11 }
  0x25   : > { %453 = vmatpush.bf16.msra.mxu1 %v723_v11  ;;  %v796_v28 = vld [vmem:[%s1150_s4] ss:$0 sm:$0xff]  ;;  %s879_s12 = scalar_lea.hbm %s878_s11, 8  ;;  %s883_s16 = scalar_lea.hbm %s1151_s5, 16 }
  0x26   : > { %371 = vmatpush.bf16.msra.mxu0 %v714_v4  ;;  %p880_p0 = scmp.ne.s32.totalorder %s878_s11, %s879_s12  ;;  %p884_p3 = scmp.lt.s32.totalorder %s878_s11, %s1151_s5 }
  0x27   : > { %p885_p4 = scmp.lt.s32.totalorder %s883_s16, %s879_s12 }
  0x28   : > { %p881_p1 = pnand %p880_p0, %p1046_p5 }
  0x29   : > { %454 = vmatpush.bf16.msra.mxu1 %v722_v12  ;;  %p886_p7 = por %p885_p4, %p884_p3 }
  0x2a   : > { %372 = vmatpush.bf16.msra.mxu0 %v713_v5  ;;  %p882_p2 = pneg %p881_p1 }
  0x2c   : > { %p887_p8 = pnand %p886_p7, %p882_p2 }
  0x2d   : > { %455 = vmatpush.bf16.msra.mxu1 %v721_v13 }
  0x2e   : > { %373 = vmatpush.bf16.msra.mxu0 %v712_v6 }
  0x31   : > { %456 = vmatpush.bf16.msra.mxu1 %v720_v14 }
  0x32   : > { %374 = vmatpush.bf16.msra.mxu0 %v711_v7 }
  0x35   : > { %457 = vmatpush.bf16.msra.mxu1 %v719_v19 }
  0x36   : > { %375 = vmatpush.bf16.msra.mxu0 %v710_v8 }
  0x39   : > { %458 = vmatpush.bf16.msra.mxu1 %v718_v20 }
  0x3a   : > { %376 = vmatpush.bf16.msra.mxu0 %v709_v9 }
  0x3d   : > { %459 = vmatpush.bf16.msra.mxu1 %v717_v21 }
  0x96   : > { %v297_v17 = vpop.permute.xlu0 %296 }
  0x97   : > { %vm298_vm0 = vcmp.eq.s32.totalorder %v294_v16, %v297_v17 }
  0x98   : > { %vm669_vm1 = vmpackc.low %vm298_vm0, %vm298_vm0 }
  0x99   : > { %670 = vmatmul.msk.bf16.vlgmr.msra.gmra.mxu0 %vm669_vm1, %v972_v18 }
 0x116   : > { %v378_v23 = vpop.f32.mrf.mxu0 }
 0x117   : > { %v379_v24 = vadd.f32 %v795_v22, %v378_v23 }
 0x119   : > { %797 = vtanh.f32 %v379_v24 }
 0x11e   : > { %v380_v25 = vpop.f32.mrf.mxu0 }
 0x11f   : > { %v798_v26 = vpop.eup %797 }
 0x120   : > { %v383_v27 = vpack.c.bf16 %v798_v26, %v798_v26 }
 0x122   : > { %460 = vmatmul.bf16.vlgmr.msra.gmra.mxu1 %v383_v27 }
 0x19f   : > { %v461_v29 = vpop.f32.mrf.mxu1 }
 0x1a0   : > { %v462_v30 = vadd.f32 %v796_v28, %v461_v29 }
 0x1a2   : > { %465 = vst [vmem:[%s280_s18] sm:$0xff] %v462_v30  ;;  %466 = vmax.xlane.f32.xlu0 %v462_v30 }
 0x1a7   : > { %v463_v31 = vpop.f32.mrf.mxu1 }
 0x215   : > { %v467_v32 = vpop.xlane.xlu0 %466 }
 0x216   : > { %v468_v33 = vsub.f32 %v462_v30, %v467_v32 }
 0x218   : > { %v469_v34 = vmul.f32 1.442695, %v468_v33 }
 0x21a   : > { %799 = vpow2.f32 %v469_v34 }
 0x220   : > { %v800_v35 = vpop.eup %799 }
 0x221   : > { %471 = vadd.xlane.f32.xlu1 %v800_v35 }
 0x222   : > { %890 = shalt.err (!%p887_p8)
}
 0x223   : > { %733 = dma.vmem_to_hbm [thread:$0]  (%p1046_p5), %s496_s29, 128, %s498_s9, %s478_s10  }
 0x224   : > { %s507_s28 = scalar_lea.hbm %s1152_s6, %s705_s19  ;;  %s287_s13 = scalar_lea.vmem [#allocation8], %s634_s15 }
 0x225   : > { %s509_s11 = sshll.u32 %s287_s13, 4  ;;  %s511_s12 = sshll.u32 %s507_s28, 4  ;;  %s510_s11 = int_to_ptr.vmem [resolvable:$true] %s509_s11  ;;  %s512_s12 = int_to_ptr.hbm [resolvable:$true] %s511_s12 }
 0x226   : > { %s483_s25 = scalar_lea.sflag [#allocation9], %s1090_s14  ;;  %s905_s16 = sshra.s32 %s512_s12, 4  ;;  %s906_s16 = int_to_ptr.hbm [resolvable:$true] %s905_s16 }
 0x227   : > { %s907_s29 = scalar_lea.hbm %s906_s16, 8  ;;  %s911_s10 = scalar_lea.hbm %s1152_s6, 16 }
 0x228   : > { %p908_p9 = scmp.ne.s32.totalorder %s906_s16, %s907_s29  ;;  %p912_p12 = scmp.lt.s32.totalorder %s906_s16, %s1152_s6 }
 0x229   : > { %p913_p13 = scmp.lt.s32.totalorder %s911_s10, %s907_s29 }
 0x22a   : > { %p909_p10 = pnand %p908_p9, %p1046_p5 }
 0x22b   : > { %p914_p0 = por %p913_p13, %p912_p12 }
 0x22c   : > { %p910_p11 = pneg %p909_p10 }
 0x22e   : > { %p915_p1 = pnand %p914_p0, %p910_p11 }
 0x294   : > { %v472_v36 = vpop.xlane.xlu1 %471 }
 0x295   : > { %801 = vlog2.f32 %v472_v36 }
 0x29b   : > { %v802_v37 = vpop.eup %801 }
 0x29c   : > { %v474_v38 = vmul.f32 0.6931472, %v802_v37 }
 0x29e   : > { %v475_v39 = vsub.f32 %v468_v33, %v474_v38 }
 0x2a0   : > { %476 = vst [vmem:[%s287_s13] sm:$0xff] %v475_v39 }
 0x2a1   : > { %918 = shalt.err (!%p915_p1)
}
 0x2a2   : > { %734 = dma.vmem_to_hbm [thread:$0]  (%p1046_p5), %s510_s11, 128, %s512_s12, %s483_s25  }
 0x2a3 PF: > { %p755_p2 = scmp.ge.s32.totalorder %s965_s24, 2  ;;  %s523_s14 = sand.u32 1, %s953_s21  }
 0x2a4   : > { %s524_s20 = scalar_lea.sflag [#allocation4], %s523_s14 }
 0x2a5   : > { %p745_p3 = pnand %p755_p2, %p1050_p6 }
 0x2a7   : > { %p746_p4 = pneg %p745_p3 }
 0x2a9   : > { %944 = dma.done.wait (%p746_p4), %s524_s20, 128  }
 0x2aa   : > { %946 = vsyncadd (%p746_p4), %s524_s20, 4294967168  ;;  %s534_s18 = scalar_lea.sflag [#allocation9], %s523_s14 }
 0x2ab   : > { %948 = dma.done.wait (%p746_p4), %s534_s18, 128  }
 0x2ac   : > { %950 = vsyncadd (%p746_p4), %s534_s18, 4294967168  ;;  %p22_p5 = scmp.ge.s32.totalorder %s1033_s27, 4   ;;  %s1156_s21 = smov %s957_s22 }
 0x2ad   : > { %s1157_s22 = smov %s961_s23  ;;  %s1158_s23 = smov %s1044_s30 }
 0x2ae   : > { %s1159_s24 = smov %s1033_s27  ;;  %24 = sbr.rel (!%p22_p5) target bundleno = 7 (0x7), region = 101 }
 0x2b3   :  { %540 = vsyncpa [#allocation3], 1 }
 0x2b4   :  { %542 = vsyncpa [#allocation3 + $0x1], 1 }
 0x2b5   :  { %543 = vsyncpa [#allocation6], 1 }
 0x2b6   :  { %544 = vsyncpa [#allocation4], 1 }
 0x2b7   :  { %546 = vsyncpa [#allocation4 + $0x1], 1 }
 0x2b8   :  { %547 = vsyncpa [#allocation9], 1 }
 0x2b9   :  { %549 = vsyncpa [#allocation9 + $0x1], 1 }

// kernel: tpu_custom_call.1
= control target key start
LH: loop header
LB: loop body
LE: loop exit
PB: predicated region body
PF: predicated region fallthrough
CT: control target
= control target key end

     0   :  { %12 = vsyncpa [#allocation3], 0  ;;  %s1146_s0 = inlined_call_operand.vmem [shape: s32[16,1], index: 0, kind: input, shape index: {}]   ;;  %s1147_s1 = inlined_call_operand.hbm [shape: bf16[128,128], index: 1, kind: input, shape index: {}]   ;;  %s1148_s2 = inlined_call_operand.vmem [shape: f32[1,128], index: 2, kind: input, shape index: {}]   ;;  %s1149_s3 = inlined_call_operand.hbm [shape: bf16[128,128], index: 3, kind: input, shape index: {}]   ;;  %s1150_s4 = inlined_call_operand.vmem [shape: f32[1,128], index: 4, kind: input, shape index: {}]   ;;  %s1151_s5 = inlined_call_operand.hbm [shape: f32[16,128], index: 5, kind: output, shape index: {0}]   ;;  %s1152_s6 = inlined_call_operand.hbm [shape: f32[16,128], index: 6, kind: output, shape index: {1}]  }
   0x1   :  { %13 = vsyncpa [#allocation6], 0 }
   0x2   :  { %14 = vsyncpa [#allocation4], 0 }
   0x3   :  { %16 = vsyncpa [#allocation4 + $0x1], 0 }
   0x4   :  { %17 = vsyncpa [#allocation9], 0 }
   0x5   :  { %19 = vsyncpa [#allocation9 + $0x1], 0  ;;  %s1008_s21 = smov 0   ;;  %s1010_s22 = smov 0  }
   0x6   :  { %s1012_s23 = smov 0   ;;  %s1014_s24 = smov 0  }
   0x7 LB: > { %s1029_s25 = sadd.s32 4294967295, %s965_s24   ;;  %s626_s26 = sadd.s32 4294967294, %s965_s24   ;;  %s965_s24 = sphi %s1014_s24, %s1159_s24   ;;  %s961_s23 = sphi %s1012_s23, %s1158_s23   ;;  %s957_s22 = sphi %s1010_s22, %s1157_s22   ;;  %s953_s21 = sphi %s1008_s21, %s1156_s21  }
   0x8   : > { %s1033_s27 = sadd.s32 1, %s965_s24   ;;  %s142_s28 = sadd.s32 1, %s961_s23 }
   0x9   : > { %s139_s29 = ssub.s32 %s965_s24, %s1033_s27  ;;  %p152_p0 = scmp.ne.s32.totalorder %s961_s23, %s957_s22 }
   0xa   : > { %p140_p1 = scmp.eq.s32.totalorder %s139_s29, 0  ;;  %p153_p2 = scmp.eq.s32.totalorder %s1029_s25, 1 }
   0xb   : > { %p158_p3 = scmp.ne.s32.totalorder %s957_s22, %s953_s21  ;;  %p159_p4 = scmp.eq.s32.totalorder %s626_s26, 1 }
   0xc   : > { %s1044_s30 = scalar_select %p140_p1, %s961_s23, %s142_s28  }
   0xd   : > { %p1046_p5 = por %p153_p2, %p152_p0  ;;  %p1050_p6 = por %p159_p4, %p158_p3 }
   0xe   : > { %p627_p7 = scmp.ge.s32.totalorder %s965_s24, 1  ;;  %p192_p8 = scmp.lt.s32.totalorder %s965_s24, 3 }
   0xf   : > { %p751_p9 = scmp.eq.s32.totalorder %s1029_s25, 0  ;;  %s203_s12 = sshll.u32 %s1147_s1, 4  ;;  %s204_s12 = int_to_ptr.hbm [resolvable:$true] %s203_s12 }
  0x10   : > { %p1057_p10 = pnand %p627_p7, %p192_p8  ;;  %s967_s13 = smov [#allocation2]  }
  0x11   : > { %s205_s14 = sshll.u32 %s967_s13, 4  ;;  %s220_s17 = sshll.u32 %s1149_s3, 4  ;;  %s206_s14 = int_to_ptr.vmem [resolvable:$true] %s205_s14  ;;  %s221_s17 = int_to_ptr.hbm [resolvable:$true] %s220_s17 }
  0x12   : > { %p737_p11 = pneg %p1057_p10  ;;  %s968_s18 = smov 64  }
  0x13   : > { %s969_s19 = smov 4   ;;  %s970_s20 = smov [#allocation5]  }
  0x14   : > { %p738_p12 = pnand %p751_p9, %p737_p11  ;;  %s222_s26 = sshll.u32 %s970_s20, 4  ;;  %s223_s26 = int_to_ptr.vmem [resolvable:$true] %s222_s26 }
  0x15   : > { %248 = sbr.rel (%p1057_p10) target bundleno = 675 (0x2a3), region = 40 }
  0x16   : > { %740 = dma.hbm_to_vmem [thread:$0]  (!%p738_p12), %s204_s12, 1024, %s206_s14, [#allocation3], %s968_s18, %s968_s18, %s969_s19  }
  0x17   : > { %743 = dma.hbm_to_vmem [thread:$0]  (!%p738_p12), %s221_s17, 1024, %s223_s26, [#allocation6], %s968_s18, %s968_s18, %s969_s19  }
  0x1a   : > { %936 = dma.done.wait (%p751_p9), [#allocation3], 1024  }
  0x1b   : > { %938 = vsyncadd (%p751_p9), [#allocation3], 4294966272 }
  0x1c   : > { %940 = dma.done.wait (%p751_p9), [#allocation6], 1024  }
  0x1d   : > { %942 = vsyncadd (%p751_p9), [#allocation6], 4294966272  ;;  %p288_p13 = scmp.lt.s32.totalorder %s1029_s25, 1  ;;  %v971_v0 = vmov 0   ;;  %v716_v2 = vld [vmem:[#allocation2 + $0x38] sm:$0xff]  ;;  %v715_v3 = vld [vmem:[#allocation2 + $0x30] sm:$0xff]  ;;  %v293_v15 = vlaneseq }
  0x1e   : > { %794 = vset.pattern.permute.xlu0 %v971_v0  ;;  %369 = vmatpush.bf16.msra.mxu0 %v716_v2  ;;  %v714_v4 = vld [vmem:[#allocation2 + $0x28] sm:$0xff]  ;;  %v713_v5 = vld [vmem:[#allocation2 + $0x20] sm:$0xff]  ;;  %v712_v6 = vld [vmem:[#allocation2 + $0x18] sm:$0xff]  ;;  %v972_v18 = vmov 1.0|1.0   ;;  %s1090_s14 = sand.u32 1, %s957_s22  }
  0x1f   : > { %s289_s28 = scalar_select %p288_p13, %s1029_s25, 1  ;;  %v711_v7 = vld [vmem:[#allocation2 + $0x10] sm:$0xff]  ;;  %v710_v8 = vld [vmem:[#allocation2 + $0x8] sm:$0xff]  ;;  %v709_v9 = vld [vmem:[#allocation2] sm:$0xff]  ;;  %v294_v16 = vand.u32 127, %v293_v15 }
  0x20   : > { %v724_v10 = vld [vmem:[#allocation5 + $0x38] sm:$0xff]  ;;  %v723_v11 = vld [vmem:[#allocation5 + $0x30] sm:$0xff]  ;;  %v722_v12 = vld [vmem:[#allocation5 + $0x28] sm:$0xff]  ;;  %s634_s15 = sshll.u32 %s1090_s14, 3  ;;  %s705_s19 = sshll.u32 %s1029_s25, 3 }
  0x21   : > { %s636_s29 = sshll.u32 %s289_s28, 3  ;;  %452 = vmatpush.bf16.msra.mxu1 %v724_v10  ;;  %v721_v13 = vld [vmem:[#allocation5 + $0x20] sm:$0xff]  ;;  %v720_v14 = vld [vmem:[#allocation5 + $0x18] sm:$0xff]  ;;  %v719_v19 = vld [vmem:[#allocation5 + $0x10] sm:$0xff]  ;;  %s280_s18 = scalar_lea.vmem [#allocation7], %s634_s15 }
  0x22   : > { %s291_s11 = scalar_lea.vmem %s1146_s0, %s636_s29  ;;  %370 = vmatpush.bf16.msra.mxu0 %v715_v3  ;;  %v718_v20 = vld [vmem:[#allocation5 + $0x8] sm:$0xff]  ;;  %v717_v21 = vld [vmem:[#allocation5] sm:$0xff]  ;;  %s493_s28 = scalar_lea.hbm %s1151_s5, %s705_s19 }
  0x23   : > { %v292_v1 = vld [vmem:[%s291_s11] sm:$0xff]  ;;  %s495_s29 = sshll.u32 %s280_s18, 4  ;;  %s497_s9 = sshll.u32 %s493_s28, 4  ;;  %s496_s29 = int_to_ptr.vmem [resolvable:$true] %s495_s29  ;;  %s498_s9 = int_to_ptr.hbm [resolvable:$true] %s497_s9 }
  0x24   : > { %296 = vperm.xlu0 %794, %v292_v1   ;;  %v795_v22 = vld [vmem:[%s1148_s2] ss:$0 sm:$0xff]  ;;  %s478_s10 = scalar_lea.sflag [#allocation4], %s1090_s14  ;;  %s877_s11 = sshra.s32 %s498_s9, 4  ;;  %s878_s11 = int_to_ptr.hbm [resolvable:$true] %s877_s11 }
  0x25   : > { %453 = vmatpush.bf16.msra.mxu1 %v723_v11  ;;  %v796_v28 = vld [vmem:[%s1150_s4] ss:$0 sm:$0xff]  ;;  %s879_s12 = scalar_lea.hbm %s878_s11, 8  ;;  %s883_s16 = scalar_lea.hbm %s1151_s5, 16 }
  0x26   : > { %371 = vmatpush.bf16.msra.mxu0 %v714_v4  ;;  %p880_p0 = scmp.ne.s32.totalorder %s878_s11, %s879_s12  ;;  %p884_p3 = scmp.lt.s32.totalorder %s878_s11, %s1151_s5 }
  0x27   : > { %p885_p4 = scmp.lt.s32.totalorder %s883_s16, %s879_s12 }
  0x28   : > { %p881_p1 = pnand %p880_p0, %p1046_p5 }
  0x29   : > { %454 = vmatpush.bf16.msra.mxu1 %v722_v12  ;;  %p886_p7 = por %p885_p4, %p884_p3 }
  0x2a   : > { %372 = vmatpush.bf16.msra.mxu0 %v713_v5  ;;  %p882_p2 = pneg %p881_p1 }
  0x2c   : > { %p887_p8 = pnand %p886_p7, %p882_p2 }
  0x2d   : > { %455 = vmatpush.bf16.msra.mxu1 %v721_v13 }
  0x2e   : > { %373 = vmatpush.bf16.msra.mxu0 %v712_v6 }
  0x31   : > { %456 = vmatpush.bf16.msra.mxu1 %v720_v14 }
  0x32   : > { %374 = vmatpush.bf16.msra.mxu0 %v711_v7 }
  0x35   : > { %457 = vmatpush.bf16.msra.mxu1 %v719_v19 }
  0x36   : > { %375 = vmatpush.bf16.msra.mxu0 %v710_v8 }
  0x39   : > { %458 = vmatpush.bf16.msra.mxu1 %v718_v20 }
  0x3a   : > { %376 = vmatpush.bf16.msra.mxu0 %v709_v9 }
  0x3d   : > { %459 = vmatpush.bf16.msra.mxu1 %v717_v21 }
  0x96   : > { %v297_v17 = vpop.permute.xlu0 %296 }
  0x97   : > { %vm298_vm0 = vcmp.eq.s32.totalorder %v294_v16, %v297_v17 }
  0x98   : > { %vm669_vm1 = vmpackc.low %vm298_vm0, %vm298_vm0 }
  0x99   : > { %670 = vmatmul.msk.bf16.vlgmr.msra.gmra.mxu0 %vm669_vm1, %v972_v18 }
 0x116   : > { %v378_v23 = vpop.f32.mrf.mxu0 }
 0x117   : > { %v379_v24 = vadd.f32 %v795_v22, %v378_v23 }
 0x119   : > { %797 = vtanh.f32 %v379_v24 }
 0x11e   : > { %v380_v25 = vpop.f32.mrf.mxu0 }
 0x11f   : > { %v798_v26 = vpop.eup %797 }
 0x120   : > { %v383_v27 = vpack.c.bf16 %v798_v26, %v798_v26 }
 0x122   : > { %460 = vmatmul.bf16.vlgmr.msra.gmra.mxu1 %v383_v27 }
 0x19f   : > { %v461_v29 = vpop.f32.mrf.mxu1 }
 0x1a0   : > { %v462_v30 = vadd.f32 %v796_v28, %v461_v29 }
 0x1a2   : > { %465 = vst [vmem:[%s280_s18] sm:$0xff] %v462_v30  ;;  %466 = vmax.xlane.f32.xlu0 %v462_v30 }
 0x1a7   : > { %v463_v31 = vpop.f32.mrf.mxu1 }
 0x215   : > { %v467_v32 = vpop.xlane.xlu0 %466 }
 0x216   : > { %v468_v33 = vsub.f32 %v462_v30, %v467_v32 }
 0x218   : > { %v469_v34 = vmul.f32 1.442695, %v468_v33 }
 0x21a   : > { %799 = vpow2.f32 %v469_v34 }
 0x220   : > { %v800_v35 = vpop.eup %799 }
 0x221   : > { %471 = vadd.xlane.f32.xlu1 %v800_v35 }
 0x222   : > { %890 = shalt.err (!%p887_p8)
}
 0x223   : > { %733 = dma.vmem_to_hbm [thread:$0]  (%p1046_p5), %s496_s29, 128, %s498_s9, %s478_s10  }
 0x224   : > { %s507_s28 = scalar_lea.hbm %s1152_s6, %s705_s19  ;;  %s287_s13 = scalar_lea.vmem [#allocation8], %s634_s15 }
 0x225   : > { %s509_s11 = sshll.u32 %s287_s13, 4  ;;  %s511_s12 = sshll.u32 %s507_s28, 4  ;;  %s510_s11 = int_to_ptr.vmem [resolvable:$true] %s509_s11  ;;  %s512_s12 = int_to_ptr.hbm [resolvable:$true] %s511_s12 }
 0x226   : > { %s483_s25 = scalar_lea.sflag [#allocation9], %s1090_s14  ;;  %s905_s16 = sshra.s32 %s512_s12, 4  ;;  %s906_s16 = int_to_ptr.hbm [resolvable:$true] %s905_s16 }
 0x227   : > { %s907_s29 = scalar_lea.hbm %s906_s16, 8  ;;  %s911_s10 = scalar_lea.hbm %s1152_s6, 16 }
 0x228   : > { %p908_p9 = scmp.ne.s32.totalorder %s906_s16, %s907_s29  ;;  %p912_p12 = scmp.lt.s32.totalorder %s906_s16, %s1152_s6 }
 0x229   : > { %p913_p13 = scmp.lt.s32.totalorder %s911_s10, %s907_s29 }
 0x22a   : > { %p909_p10 = pnand %p908_p9, %p1046_p5 }
 0x22b   : > { %p914_p0 = por %p913_p13, %p912_p12 }
 0x22c   : > { %p910_p11 = pneg %p909_p10 }
 0x22e   : > { %p915_p1 = pnand %p914_p0, %p910_p11 }
 0x294   : > { %v472_v36 = vpop.xlane.xlu1 %471 }
 0x295   : > { %801 = vlog2.f32 %v472_v36 }
 0x29b   : > { %v802_v37 = vpop.eup %801 }
 0x29c   : > { %v474_v38 = vmul.f32 0.6931472, %v802_v37 }
 0x29e   : > { %v475_v39 = vsub.f32 %v468_v33, %v474_v38 }
 0x2a0   : > { %476 = vst [vmem:[%s287_s13] sm:$0xff] %v475_v39 }
 0x2a1   : > { %918 = shalt.err (!%p915_p1)
}
 0x2a2   : > { %734 = dma.vmem_to_hbm [thread:$0]  (%p1046_p5), %s510_s11, 128, %s512_s12, %s483_s25  }
 0x2a3 PF: > { %p755_p2 = scmp.ge.s32.totalorder %s965_s24, 2  ;;  %s523_s14 = sand.u32 1, %s953_s21  }
 0x2a4   : > { %s524_s20 = scalar_lea.sflag [#allocation4], %s523_s14 }
 0x2a5   : > { %p745_p3 = pnand %p755_p2, %p1050_p6 }
 0x2a7   : > { %p746_p4 = pneg %p745_p3 }
 0x2a9   : > { %944 = dma.done.wait (%p746_p4), %s524_s20, 128  }
 0x2aa   : > { %946 = vsyncadd (%p746_p4), %s524_s20, 4294967168  ;;  %s534_s18 = scalar_lea.sflag [#allocation9], %s523_s14 }
 0x2ab   : > { %948 = dma.done.wait (%p746_p4), %s534_s18, 128  }
 0x2ac   : > { %950 = vsyncadd (%p746_p4), %s534_s18, 4294967168  ;;  %p22_p5 = scmp.ge.s32.totalorder %s1033_s27, 4   ;;  %s1156_s21 = smov %s957_s22 }
 0x2ad   : > { %s1157_s22 = smov %s961_s23  ;;  %s1158_s23 = smov %s1044_s30 }
 0x2ae   : > { %s1159_s24 = smov %s1033_s27  ;;  %24 = sbr.rel (!%p22_p5) target bundleno = 7 (0x7), region = 101 }
 0x2b3   :  { %540 = vsyncpa [#allocation3], 1 }
 0x2b4   :  { %542 = vsyncpa [#allocation3 + $0x1], 1 }
 0x2b5   :  { %543 = vsyncpa [#allocation6], 1 }
 0x2b6   :  { %544 = vsyncpa [#allocation4], 1 }
 0x2b7   :  { %546 = vsyncpa [#allocation4 + $0x1], 1 }
 0x2b8   :  { %547 = vsyncpa [#allocation9], 1 }
 0x2b9   :  { %549 = vsyncpa [#allocation9 + $0x1], 1 }

</bundles_post_ra>
